<compile_context>
chip_gen: v7x
topology: tpu7x:2x2x1
jax: 0.10.0
libtpu: 0.0.40
codegen_flags: <defaults>
</compile_context>

<pallas_src>
import functools

import jax
import jax.numpy as jnp
from jax.experimental import pallas as pl
from jax.experimental.pallas import tpu as pltpu

LANE = 128   # TPU lane width
SUB = 8      # TPU sublane count (f32)


def _round_up(x, m):
    return ((x + m - 1) // m) * m


# ----------------------------------------------------------------------------
# Pallas kernel: one batch tile (batch on the lane axis)
# ----------------------------------------------------------------------------
def _ren_forward_kernel(nl, xu_ref, wstatic_ref, d11_ref, gyw_ref, y_ref):
    nl_pad = d11_ref.shape[0]

    # --- ONE MXU matmul for all static contributions -----------------------
    #   rows [0, nl_pad)              : implicit-nonlinearity pre-activations
    #                                   (1/Lambda already folded into weights)
    #   rows [nl_pad, nl_pad+dout_pad): x0/u part of the output map, with the
    #                                   state update E^{-1}(F x0 + B2 u) and C2
    #                                   folded in on the wrapper side.
    pre = jnp.dot(wstatic_ref[...], xu_ref[...],
                  preferred_element_type=jnp.float32)            # (R_pad, TB)
    acc = pre[0:nl_pad, :]                                       # (nl_pad, TB)
    y_static = pre[nl_pad:, :]                                   # (dout_pad, TB)

    # Weight columns: data-independent loads/broadcasts, off the serial chain.
    d11 = d11_ref[...]                                           # (nl_pad, nl_pad)

    # --- sequential implicit solve ------------------------------------------
    # D11 is STRICTLY lower triangular (set_param: -tril(H22, -1)), so row i of
    # `acc` is final when read (the update with column j only touches rows > j).
    # The last column is all-zero, so its update is skipped.
    for i in range(nl - 1):
        w_i = jnp.tanh(acc[i:i + 1, :])           # (1, TB) lane-dense tanh (EUP)
        acc = acc + d11[:, i:i + 1] * w_i         # rank-1 FMA, sublane-bcast of w_i

    # All rows of acc now hold final pre-activations -> recompute tanh in
    # parallel (off the serial chain; padded rows are exactly zero -> tanh 0).
    w_all = jnp.tanh(acc)                                        # (nl_pad, TB)

    # --- w contribution to the output (E^{-1} B1 and C2 folded into gyw) ----
    y = y_static + jnp.dot(gyw_ref[...], w_all,
                           preferred_element_type=jnp.float32)   # (dout_pad, TB)

    # Bounded output; narrow, lane-dense, unmasked store.
    y_ref[...] = 8.0 + (12.8 - 8.0) * jax.nn.sigmoid(y)


# ----------------------------------------------------------------------------
# Weight packing (wrapper-side, plain JAX, f32)
# ----------------------------------------------------------------------------
def _pack_ren_weights(mats, with_state_input):
    f32 = lambda a: jnp.asarray(a, jnp.float32)
    C1, D11, D12 = f32(mats['C1']), f32(mats['D11']), f32(mats['D12'])
    F_m, B1, B2, E = f32(mats['F']), f32(mats['B1']), f32(mats['B2']), f32(mats['E'])
    lam = f32(mats['Lambda']).reshape(-1)
    C2, D21, D22 = f32(mats['C2']), f32(mats['D21']), f32(mats['D22'])

    nl, ns = C1.shape
    dout, din = D22.shape
    assert max(nl, ns, din, dout) <= LANE, "dims above 128 need a wider packing"

    # The sequential substitution in the kernel is only valid for a STRICTLY
    # lower-triangular D11 (guaranteed by set_param's construction).
    try:
        upper = float(jnp.max(jnp.abs(jnp.triu(D11))))
        assert upper == 0.0, "REN kernel requires a strictly lower-triangular D11"
    except jax.errors.ConcretizationTypeError:
        pass  # traced weights: structure cannot be checked at trace time

    # Fold 1/Lambda into the implicit-nonlinearity rows (no per-iteration divide).
    inv_lam = (1.0 / lam)[:, None]
    C1s, D11s, D12s = C1 * inv_lam, D11 * inv_lam, D12 * inv_lam

    # Fold the state update and the output map:
    #   y = C2 E^{-1} (F x0 + B1 w + B2 u) + D21 w + D22 u
    Fe = jnp.linalg.solve(E, F_m)
    B1e = jnp.linalg.solve(E, B1)
    B2e = jnp.linalg.solve(E, B2)
    Gy_x = C2 @ Fe
    Gy_w = C2 @ B1e + D21
    Gy_u = C2 @ B2e + D22

    nl_pad, dout_pad = _round_up(nl, SUB), _round_up(dout, SUB)

    if with_state_input:
        V = jnp.concatenate([C1s, D12s], axis=1)     # (nl,   ns + din)
        G = jnp.concatenate([Gy_x, Gy_u], axis=1)    # (dout, ns + din)
        kxu = ns + din
    else:                                            # known-zero initial state
        V, G, kxu = D12s, Gy_u, din
    kxu_pad = _round_up(kxu, SUB)

    wstatic = jnp.zeros((nl_pad + dout_pad, kxu_pad), jnp.float32)
    wstatic = wstatic.at[:nl, :kxu].set(V)
    wstatic = wstatic.at[nl_pad:nl_pad + dout, :kxu].set(G)

    d11p = jnp.zeros((nl_pad, nl_pad), jnp.float32).at[:nl, :nl].set(D11s)
    gywp = jnp.zeros((dout_pad, nl_pad), jnp.float32).at[:dout, :nl].set(Gy_w)

    dims = dict(ns=ns, nl=nl, din=din, dout=dout,
                nl_pad=nl_pad, dout_pad=dout_pad, kxu=kxu, kxu_pad=kxu_pad)
    return wstatic, d11p, gywp, dims


# ----------------------------------------------------------------------------
# Wrapper: batch grid on the lane axis, resident weights, narrow output
# ----------------------------------------------------------------------------
def ren_forward(u, mats, x0=None, *, batch_tile=512):
    """REN forward: y = 8 + 4.8*sigmoid(C2 x+ + D21 w + D22 u),
       x+ = E^{-1}(F x0 + B1 w + B2 u).

    u  : (batch, dim_in) or (batch, 1, dim_in)
    x0 : None (zero initial state, the module's init_x) or (batch, dim_internal)
    """
    u = jnp.asarray(u, jnp.float32)
    if u.ndim == 3:
        u = u[:, 0, :]
    batch, din = u.shape

    with_state = x0 is not None
    wstatic, d11p, gywp, dm = _pack_ren_weights(mats, with_state)
    assert dm['din'] == din

    # Batch tile on the LANE axis; keep >=2 grid steps when possible so both
    # v7x TensorCores get work ("parallel" grid axis).
    batch_lanes = _round_up(batch, LANE)
    TB = max(LANE, (min(batch_tile, batch_lanes) // LANE) * LANE)
    if batch_lanes >= 2 * LANE and batch_lanes // TB < 2:
        TB = max(LANE, pl.cdiv(batch_lanes, 2 * LANE) * LANE)
    batch_pad = _round_up(batch_lanes, TB)

    # Transposed [x0 ; u] slab: features on sublanes, batch on lanes (zero pad).
    parts = []
    if with_state:
        x0 = jnp.asarray(x0, jnp.float32)
        if x0.ndim == 3:
            x0 = x0[:, 0, :]
        assert x0.shape == (batch, dm['ns'])
        parts.append(x0.T)
    parts.append(u.T)
    xu = parts[0] if len(parts) == 1 else jnp.concatenate(parts, axis=0)
    xu = jnp.pad(xu, ((0, dm['kxu_pad'] - dm['kxu']), (0, batch_pad - batch)))

    kernel = functools.partial(_ren_forward_kernel, dm['nl'])
    r_pad = dm['nl_pad'] + dm['dout_pad']

    y_t = pl.pallas_call(
        kernel,
        out_shape=jax.ShapeDtypeStruct((dm['dout_pad'], batch_pad), jnp.float32),
        grid_spec=pltpu.PrefetchScalarGridSpec(
            num_scalar_prefetch=0,
            grid=(batch_pad // TB,),
            in_specs=[
                pl.BlockSpec((dm['kxu_pad'], TB), lambda b: (0, b)),
                # tiny weights, constant index map -> resident across grid steps
                pl.BlockSpec((r_pad, dm['kxu_pad']), lambda b: (0, 0)),
                pl.BlockSpec((dm['nl_pad'], dm['nl_pad']), lambda b: (0, 0)),
                pl.BlockSpec((dm['dout_pad'], dm['nl_pad']), lambda b: (0, 0)),
            ],
            out_specs=pl.BlockSpec((dm['dout_pad'], TB), lambda b: (0, b)),
        ),
        compiler_params=pltpu.CompilerParams(
            dimension_semantics=("parallel",)),
    )(xu, wstatic, d11p, gywp)

    # (dout_pad, batch_pad) -> (batch, dout); tiny transpose outside the kernel.
    return y_t[:dm['dout'], :batch].T


# ----------------------------------------------------------------------------
# Plain-JAX parameter setup (mirrors REN.__init__ / REN.set_param, 'l2stable')
# ----------------------------------------------------------------------------
def make_ren_params(key, dim_in, dim_out, dim_internal, dim_nl, std=0.5):
    ks = jax.random.split(key, 9)
    dmin = min(dim_in, dim_out)
    p = {
        'X':  jax.random.normal(ks[0], (2 * dim_internal + dim_nl,
                                        2 * dim_internal + dim_nl)) * std,
        'Y':  jax.random.normal(ks[1], (dim_internal, dim_internal)) * std,
        'B2': jax.random.normal(ks[2], (dim_internal, dim_in)) * std,
        'C2': jax.random.normal(ks[3], (dim_out, dim_internal)) * std,
        'Z3': jax.random.normal(ks[4], (abs(dim_out - dim_in), dmin)) * std,
        'X3': jax.random.normal(ks[5], (dmin, dmin)) * std,
        'Y3': jax.random.normal(ks[6], (dmin, dmin)) * std,
        'D12': jax.random.normal(ks[7], (dim_nl, dim_in)) * std,
        'gamma': jax.random.normal(ks[8], (1, 1)) * 3.0,
    }
    return {k: v.astype(jnp.float32) for k, v in p.items()}


def set_param(p, dim_in, dim_out, dim_internal, dim_nl, eps=1e-3):
    gamma = jnp.abs(p['gamma'])
    I_in, I_out = jnp.eye(dim_in), jnp.eye(dim_out)
    I_min = jnp.eye(min(dim_in, dim_out))

    # mode == 'l2stable'
    Q = -(1.0 / gamma) * I_out
    R = gamma * I_in
    S = jnp.zeros((dim_in, dim_out))

    X3, Y3, Z3 = p['X3'], p['Y3'], p['Z3']
    M = X3.T @ X3 + Y3 - Y3.T + Z3.T @ Z3 + eps * I_min
    if dim_out >= dim_in:
        invIM = jnp.linalg.inv(I_in + M)
        N = jnp.vstack(((I_in - M) @ invIM, -2.0 * Z3 @ invIM))
    else:
        invIM = jnp.linalg.inv(I_out + M)
        N = jnp.hstack((invIM @ (I_out - M), -2.0 * invIM @ Z3.T))

    Lq = jnp.linalg.cholesky(-Q).T
    Lr = jnp.linalg.cholesky(R - S @ jnp.linalg.inv(Q) @ S.T).T
    D22 = -jnp.linalg.inv(Q) @ S.T + jnp.linalg.inv(Lq) @ (N @ Lr)

    R_cal = R + S @ D22 + (S @ D22).T + D22.T @ Q @ D22
    R_cal_inv = jnp.linalg.inv(R_cal)

    C2, B2, D12, X, Y = p['C2'], p['B2'], p['D12'], p['X'], p['Y']
    D21 = jnp.zeros((dim_out, dim_nl))

    C2_cal = (D22.T @ Q + S) @ C2
    D21_cal = (D22.T @ Q + S) @ D21 - D12.T
    vec_r = jnp.concatenate((C2_cal.T, D21_cal.T, B2), axis=0)
    psi_r = vec_r @ R_cal_inv @ vec_r.T
    vec_q = jnp.concatenate((C2.T, D21.T, jnp.zeros((dim_internal, dim_out))),
                            axis=0)
    psi_q = vec_q @ Q @ vec_q.T

    nH = 2 * dim_internal + dim_nl
    H = X.T @ X + eps * jnp.eye(nH) + psi_r - psi_q

    s, n = dim_internal, dim_nl
    H11 = H[:s, :s]
    H21 = H[s:s + n, :s]
    H22 = H[s:s + n, s:s + n]
    H31 = H[s + n:, :s]
    H32 = H[s + n:, s:s + n]
    H33 = H[s + n:, s + n:]

    P_cal = H33
    F_mat = H31
    B1 = H32
    E = 0.5 * (H11 + P_cal + Y - Y.T)
    Lambda = 0.5 * jnp.diag(H22)
    D11 = -jnp.tril(H22, k=-1)
    C1 = -H21

    return dict(F=F_mat, B1=B1, B2=B2, E=E, Lambda=Lambda, D11=D11, C1=C1,
                C2=C2, D21=D21, D12=D12, D22=D22)


# ----------------------------------------------------------------------------
# Pure-JAX reference of the PyTorch forward (for correctness check)
# ----------------------------------------------------------------------------
def ren_forward_reference(u, x0, mats):
    C1, D11, D12 = mats['C1'], mats['D11'], mats['D12']
    lam = mats['Lambda']
    F_m, B1, B2, E = mats['F'], mats['B1'], mats['B2'], mats['E']
    C2, D21, D22 = mats['C2'], mats['D21'], mats['D22']
    batch = u.shape[0]
    nl = C1.shape[0]
    w = jnp.zeros((batch, nl), jnp.float32)
    for i in range(nl):
        v = x0 @ C1[i] + w @ D11[i] + u @ D12[i]
        w = w.at[:, i].set(jnp.tanh(v / lam[i]))
    x_new = (x0 @ F_m.T + w @ B1.T + u @ B2.T) @ jnp.linalg.inv(E).T
    y = x_new @ C2.T + w @ D21.T + u @ D22.T
    return 8.0 + (12.8 - 8.0) * jax.nn.sigmoid(y)


if __name__ == "__main__":
    # Small shapes consistent with the module's forward.
    dim_in, dim_out, dim_internal, dim_nl = 4, 5, 8, 8
    batch = 2

    key = jax.random.PRNGKey(0)
    kp, ku = jax.random.split(key)
    kx = jax.random.fold_in(key, 1)

    params = make_ren_params(kp, dim_in, dim_out, dim_internal, dim_nl)
    mats = set_param(params, dim_in, dim_out, dim_internal, dim_nl)

    u = jax.random.normal(ku, (batch, dim_in), jnp.float32)

    # Path 1: the module's actual forward (init_x == zeros) -> no state operand.
    y = ren_forward(u, mats)
    jax.block_until_ready(y)
    x0_zero = jnp.zeros((batch, dim_internal), jnp.float32)
    y_ref = ren_forward_reference(u, x0_zero, mats)

    assert y.shape == (batch, dim_out)
    assert bool(jnp.all(jnp.isfinite(y)))
    assert bool(jnp.all((y >= 8.0) & (y <= 12.8)))
    assert bool(jnp.allclose(y, y_ref, rtol=1e-3, atol=1e-3))

    # Path 2: explicit non-zero internal state (stateful recurrent use).
    x0 = 0.1 * jax.random.normal(kx, (batch, dim_internal), jnp.float32)
    y2 = ren_forward(u, mats, x0=x0)
    jax.block_until_ready(y2)
    y2_ref = ren_forward_reference(u, x0, mats)
    assert bool(jnp.allclose(y2, y2_ref, rtol=1e-3, atol=1e-3))

    print("KERNEL_OK")
</pallas_src>

<mosaic_0001>
module attributes {stable_mosaic.version = 11 : i64} {
  func.func @_ren_forward_kernel(%arg0: i32, %arg1: memref<8x128xf32, #tpu.memory_space<vmem>>, %arg2: memref<16x8xf32, #tpu.memory_space<vmem>>, %arg3: memref<8x8xf32, #tpu.memory_space<vmem>>, %arg4: memref<8x8xf32, #tpu.memory_space<vmem>>, %arg5: memref<8x128xf32, #tpu.memory_space<vmem>>) attributes {dimension_semantics = [#tpu.dimension_semantics<parallel>], iteration_bounds = array<i64: 1>, scalar_prefetch = 0 : i64, scratch_operands = 0 : i64, tpu.core_type = #tpu.core_type<tc>, window_params = [{transform_indices = @transform_0, window_bounds = array<i64: 8, 128>}, {pipeline_mode = #tpu.pipeline_mode<synchronous>, transform_indices = @transform_1, window_bounds = array<i64: 16, 8>}, {pipeline_mode = #tpu.pipeline_mode<synchronous>, transform_indices = @transform_2, window_bounds = array<i64: 8, 8>}, {pipeline_mode = #tpu.pipeline_mode<synchronous>, transform_indices = @transform_3, window_bounds = array<i64: 8, 8>}, {transform_indices = @transform_4, window_bounds = array<i64: 8, 128>}]} {
    %c0 = arith.constant 0 : index
    %c0_0 = arith.constant 0 : index
    %0 = vector.load %arg2[%c0, %c0_0] : memref<16x8xf32, #tpu.memory_space<vmem>>, vector<16x8xf32>
    %c0_1 = arith.constant 0 : index
    %c0_2 = arith.constant 0 : index
    %1 = vector.load %arg1[%c0_1, %c0_2] : memref<8x128xf32, #tpu.memory_space<vmem>>, vector<8x128xf32>
    %cst = arith.constant dense<0.000000e+00> : vector<16x128xf32>
    %2 = tpu.matmul %0, %1, %cst {dimension_numbers = #tpu.dot_dimension_numbers<[1], [0], [0], [1], [0, 0, 1, 1], [], []>} : vector<16x8xf32>, vector<8x128xf32>, vector<16x128xf32> -> vector<16x128xf32>
    %3 = vector.extract_strided_slice %2 {offsets = [0, 0], sizes = [8, 128], strides = [1, 1]} : vector<16x128xf32> to vector<8x128xf32>
    %4 = vector.extract_strided_slice %2 {offsets = [8, 0], sizes = [8, 128], strides = [1, 1]} : vector<16x128xf32> to vector<8x128xf32>
    %c0_3 = arith.constant 0 : index
    %c0_4 = arith.constant 0 : index
    %5 = vector.load %arg3[%c0_3, %c0_4] : memref<8x8xf32, #tpu.memory_space<vmem>>, vector<8x8xf32>
    %6 = vector.extract_strided_slice %3 {offsets = [0, 0], sizes = [1, 128], strides = [1, 1]} : vector<8x128xf32> to vector<1x128xf32>
    %7 = math.tanh %6 : vector<1x128xf32>
    %8 = vector.extract_strided_slice %5 {offsets = [0, 0], sizes = [8, 1], strides = [1, 1]} : vector<8x8xf32> to vector<8x1xf32>
    %9 = vector.broadcast %8 : vector<8x1xf32> to vector<8x128xf32>
    %10 = vector.broadcast %7 : vector<1x128xf32> to vector<8x128xf32>
    %11 = arith.mulf %9, %10 : vector<8x128xf32>
    %12 = arith.addf %3, %11 : vector<8x128xf32>
    %13 = vector.extract_strided_slice %12 {offsets = [1, 0], sizes = [1, 128], strides = [1, 1]} : vector<8x128xf32> to vector<1x128xf32>
    %14 = math.tanh %13 : vector<1x128xf32>
    %15 = vector.extract_strided_slice %5 {offsets = [0, 1], sizes = [8, 1], strides = [1, 1]} : vector<8x8xf32> to vector<8x1xf32>
    %16 = vector.broadcast %15 : vector<8x1xf32> to vector<8x128xf32>
    %17 = vector.broadcast %14 : vector<1x128xf32> to vector<8x128xf32>
    %18 = arith.mulf %16, %17 : vector<8x128xf32>
    %19 = arith.addf %12, %18 : vector<8x128xf32>
    %20 = vector.extract_strided_slice %19 {offsets = [2, 0], sizes = [1, 128], strides = [1, 1]} : vector<8x128xf32> to vector<1x128xf32>
    %21 = math.tanh %20 : vector<1x128xf32>
    %22 = vector.extract_strided_slice %5 {offsets = [0, 2], sizes = [8, 1], strides = [1, 1]} : vector<8x8xf32> to vector<8x1xf32>
    %23 = vector.broadcast %22 : vector<8x1xf32> to vector<8x128xf32>
    %24 = vector.broadcast %21 : vector<1x128xf32> to vector<8x128xf32>
    %25 = arith.mulf %23, %24 : vector<8x128xf32>
    %26 = arith.addf %19, %25 : vector<8x128xf32>
    %27 = vector.extract_strided_slice %26 {offsets = [3, 0], sizes = [1, 128], strides = [1, 1]} : vector<8x128xf32> to vector<1x128xf32>
    %28 = math.tanh %27 : vector<1x128xf32>
    %29 = vector.extract_strided_slice %5 {offsets = [0, 3], sizes = [8, 1], strides = [1, 1]} : vector<8x8xf32> to vector<8x1xf32>
    %30 = vector.broadcast %29 : vector<8x1xf32> to vector<8x128xf32>
    %31 = vector.broadcast %28 : vector<1x128xf32> to vector<8x128xf32>
    %32 = arith.mulf %30, %31 : vector<8x128xf32>
    %33 = arith.addf %26, %32 : vector<8x128xf32>
    %34 = vector.extract_strided_slice %33 {offsets = [4, 0], sizes = [1, 128], strides = [1, 1]} : vector<8x128xf32> to vector<1x128xf32>
    %35 = math.tanh %34 : vector<1x128xf32>
    %36 = vector.extract_strided_slice %5 {offsets = [0, 4], sizes = [8, 1], strides = [1, 1]} : vector<8x8xf32> to vector<8x1xf32>
    %37 = vector.broadcast %36 : vector<8x1xf32> to vector<8x128xf32>
    %38 = vector.broadcast %35 : vector<1x128xf32> to vector<8x128xf32>
    %39 = arith.mulf %37, %38 : vector<8x128xf32>
    %40 = arith.addf %33, %39 : vector<8x128xf32>
    %41 = vector.extract_strided_slice %40 {offsets = [5, 0], sizes = [1, 128], strides = [1, 1]} : vector<8x128xf32> to vector<1x128xf32>
    %42 = math.tanh %41 : vector<1x128xf32>
    %43 = vector.extract_strided_slice %5 {offsets = [0, 5], sizes = [8, 1], strides = [1, 1]} : vector<8x8xf32> to vector<8x1xf32>
    %44 = vector.broadcast %43 : vector<8x1xf32> to vector<8x128xf32>
    %45 = vector.broadcast %42 : vector<1x128xf32> to vector<8x128xf32>
    %46 = arith.mulf %44, %45 : vector<8x128xf32>
    %47 = arith.addf %40, %46 : vector<8x128xf32>
    %48 = vector.extract_strided_slice %47 {offsets = [6, 0], sizes = [1, 128], strides = [1, 1]} : vector<8x128xf32> to vector<1x128xf32>
    %49 = math.tanh %48 : vector<1x128xf32>
    %50 = vector.extract_strided_slice %5 {offsets = [0, 6], sizes = [8, 1], strides = [1, 1]} : vector<8x8xf32> to vector<8x1xf32>
    %51 = vector.broadcast %50 : vector<8x1xf32> to vector<8x128xf32>
    %52 = vector.broadcast %49 : vector<1x128xf32> to vector<8x128xf32>
    %53 = arith.mulf %51, %52 : vector<8x128xf32>
    %54 = arith.addf %47, %53 : vector<8x128xf32>
    %55 = math.tanh %54 : vector<8x128xf32>
    %c0_5 = arith.constant 0 : index
    %c0_6 = arith.constant 0 : index
    %56 = vector.load %arg4[%c0_5, %c0_6] : memref<8x8xf32, #tpu.memory_space<vmem>>, vector<8x8xf32>
    %cst_7 = arith.constant dense<0.000000e+00> : vector<8x128xf32>
    %57 = tpu.matmul %56, %55, %cst_7 {dimension_numbers = #tpu.dot_dimension_numbers<[1], [0], [0], [1], [0, 0, 1, 1], [], []>} : vector<8x8xf32>, vector<8x128xf32>, vector<8x128xf32> -> vector<8x128xf32>
    %58 = arith.addf %4, %57 : vector<8x128xf32>
    %59 = arith.negf %58 : vector<8x128xf32>
    %60 = math.exp %59 : vector<8x128xf32>
    %cst_8 = arith.constant 1.000000e+00 : f32
    %61 = vector.broadcast %cst_8 : f32 to vector<8x128xf32>
    %62 = arith.addf %61, %60 : vector<8x128xf32>
    %63 = arith.divf %61, %62 : vector<8x128xf32>
    %cst_9 = arith.constant 4.800000e+00 : f32
    %64 = vector.broadcast %cst_9 : f32 to vector<8x128xf32>
    %65 = arith.mulf %64, %63 : vector<8x128xf32>
    %cst_10 = arith.constant 8.000000e+00 : f32
    %66 = vector.broadcast %cst_10 : f32 to vector<8x128xf32>
    %67 = arith.addf %66, %65 : vector<8x128xf32>
    %c0_11 = arith.constant 0 : index
    %c0_12 = arith.constant 0 : index
    %68 = vector.load %arg5[%c0_11, %c0_12] : memref<8x128xf32, #tpu.memory_space<vmem>>, vector<8x128xf32>
    tpu.vector_store %arg5[%c0_11, %c0_12], %67 {strides = array<i32>} : memref<8x128xf32, #tpu.memory_space<vmem>>, vector<8x128xf32>,
    return
  }
  func.func @transform_0(%arg0: i32) -> (i32, i32) {
    %c0_i32 = arith.constant 0 : i32
    %c0_i32_0 = arith.constant 0 : i32
    return %c0_i32, %arg0 : i32, i32
  }
  func.func @transform_1(%arg0: i32) -> (i32, i32) {
    %c0_i32 = arith.constant 0 : i32
    %c0_i32_0 = arith.constant 0 : i32
    %c0_i32_1 = arith.constant 0 : i32
    return %c0_i32, %c0_i32_0 : i32, i32
  }
  func.func @transform_2(%arg0: i32) -> (i32, i32) {
    %c0_i32 = arith.constant 0 : i32
    %c0_i32_0 = arith.constant 0 : i32
    %c0_i32_1 = arith.constant 0 : i32
    return %c0_i32, %c0_i32_0 : i32, i32
  }
  func.func @transform_3(%arg0: i32) -> (i32, i32) {
    %c0_i32 = arith.constant 0 : i32
    %c0_i32_0 = arith.constant 0 : i32
    %c0_i32_1 = arith.constant 0 : i32
    return %c0_i32, %c0_i32_0 : i32, i32
  }
  func.func @transform_4(%arg0: i32) -> (i32, i32) {
    %c0_i32 = arith.constant 0 : i32
    %c0_i32_0 = arith.constant 0 : i32
    return %c0_i32, %arg0 : i32, i32
  }
}

</mosaic_0001>

<bundles_post_ra>
// kernel: tpu_custom_call.1
= control target key start
LH: loop header
LB: loop body
LE: loop exit
PB: predicated region body
PF: predicated region fallthrough
CT: control target
= control target key end

     0   :  { %vm21_vm0 = vcmask 64512   ;;  %v362_v4 = vmov 0   ;;  %s427_s0 = inlined_call_operand.vmem [shape: f32[8,128], index: 0, kind: input, shape index: {}]   ;;  %s428_s1 = inlined_call_operand.vmem [shape: f32[16,8], index: 1, kind: input, shape index: {}]   ;;  %s429_s2 = inlined_call_operand.vmem [shape: f32[8,8], index: 2, kind: input, shape index: {}]   ;;  %s430_s3 = inlined_call_operand.vmem [shape: f32[8,8], index: 3, kind: input, shape index: {}]   ;;  %s431_s4 = inlined_call_operand.hbm [shape: f32[8,128], index: 4, kind: output, shape index: {}]  }
   0x1   :  { %v20_v0 = vld [vmem:[%s427_s0] sm:$0xff]  ;;  %v19_v2 = vld [vmem:[%s428_s1 + $0x8] sm:$0xff]  ;;  %310 = vset.pattern.permute.xlu0 %v362_v4 }
   0x2   :  { %v18_v1 = vld [vmem:[%s428_s1] sm:$0xff]  ;;  %290 = vmatprep.subr.mxu0 %v20_v0 }
   0x3   :  { %292 = vmatprep.mubr.msk.f32.mxu0 %vm21_vm0, %v18_v1  ;;  %v103_v3 = vld [vmem:[%s429_s2] sm:$0xff]  ;;  %291 = vmatpush3.msra.mxu0 %v20_v0 }
   0x4   :  { %9 = vsyncpa [#allocation3], 0  ;;  %293 = vmatmul.mubr.msk.f32.vlgmr.msra.gmra.mrb[0].mxu0 %vm21_vm0, %v19_v2  ;;  %107 = vperm.xlu0 %310, %v103_v3   ;;  %v363_v5 = vmov 2   ;;  %v364_v6 = vmov 1   ;;  %v365_v7 = vmov 3   ;;  %v366_v8 = vmov 5  }
   0x5   :  { %312 = vset.pattern.permute.xlu1 %v363_v5  ;;  %v367_v9 = vmov 4   ;;  %v368_v10 = vmov 6   ;;  %v369_v11 = vmov 0.0   ;;  %v110_v14 = vlaneseq  ;;  %v183_v58 = vld [vmem:[%s430_s3] sm:$0xff]  ;;  %s371_s2 = smov [#allocation2]  }
   0x6   :  { %129 = vperm.xlu1 %312, %v103_v3   ;;  %295 = vmatprep.subr.mxu1 %v369_v11  ;;  %vm370_vm1 = vmmov 0   ;;  %s273_s23 = sshll.u32 %s371_s2, 4  ;;  %s274_s23 = int_to_ptr.vmem [resolvable:$true] %s273_s23 }
   0x7   :  { %297 = vmatprep.mubr.msk.f32.mxu1 %vm370_vm1, %v369_v11  ;;  %v111_v15 = vshrl.u32 %v110_v14, 7  ;;  %s338_s3 = scalar_lea.vmem %s274_s23, 128  ;;  %p343_p1 = scmp.lt.s32.totalorder %s274_s23, %s274_s23 }
   0x8   :  { %311 = vset.pattern.permute.xlu0 %v364_v6  ;;  %p339_p0 = scmp.ne.s32.totalorder %s274_s23, %s338_s3  ;;  %p344_p2 = scmp.lt.s32.totalorder %s338_s3, %s338_s3 }
   0x9   :  { %118 = vperm.xlu0 %311, %v103_v3   ;;  %v112_v16 = vsub.s32 0, %v111_v15  ;;  %v123_v22 = vsub.s32 1, %v111_v15  ;;  %v134_v28 = vsub.s32 2, %v111_v15  ;;  %v145_v34 = vsub.s32 3, %v111_v15 }
   0xa   :  { %313 = vset.pattern.permute.xlu1 %v365_v7  ;;  %v156_v40 = vsub.s32 4, %v111_v15  ;;  %v167_v46 = vsub.s32 5, %v111_v15  ;;  %v178_v52 = vsub.s32 6, %v111_v15  ;;  %p345_p3 = por %p344_p2, %p343_p1 }
   0xb   :  { %140 = vperm.xlu1 %313, %v103_v3  }
   0xc   :  { %p346_p4 = pnand %p345_p3, %p339_p0 }
   0xd   :  { %315 = vset.pattern.permute.xlu0 %v366_v8 }
   0xe   :  { %162 = vperm.xlu0 %315, %v103_v3  }
   0xf   :  { %314 = vset.pattern.permute.xlu1 %v367_v9 }
  0x10   :  { %151 = vperm.xlu1 %314, %v103_v3  }
  0x12   :  { %317 = vset.pattern.permute.xlu0 %v368_v10 }
  0x14   :  { %316 = vset.pattern.permute.xlu1 %v368_v10 }
  0x15   :  { %173 = vperm.xlu1 %316, %v103_v3  }
  0x83   :  { %v108_v18 = vpop.permute.xlu0 %107 }
  0x85   :  { %v130_v30 = vpop.permute.xlu1 %129 }
  0x88   :  { %v119_v24 = vpop.permute.xlu0 %118 }
  0x8a   :  { %v141_v36 = vpop.permute.xlu1 %140 }
  0x8d   :  { %v163_v48 = vpop.permute.xlu0 %162 }
  0x8f   :  { %v152_v42 = vpop.permute.xlu1 %151 }
  0x94   :  { %v174_v54 = vpop.permute.xlu1 %173 }
  0xd7   :  { %v294_v12 = vpop.f32.mrb[0].mxu0 }
  0xd8   :  { %v94_v13 = vpop.f32.mrb[1].mxu0 }
  0xd9   :  { %318 = vtanh.f32 %v94_v13 }
  0xe3   :  { %v319_v17 = vpop.eup %318 }
  0xe4   :  { %v113_v19 = vrot.slane %v319_v17, %v112_v16 }
  0xe6   :  { %v114_v20 = vmul.f32 %v113_v19, %v108_v18 }
  0xe8   :  { %v115_v21 = vadd.f32 %v114_v20, %v94_v13 }
  0xea   :  { %320 = vtanh.f32 %v115_v21 }
  0xf4   :  { %v321_v23 = vpop.eup %320 }
  0xf5   :  { %v124_v25 = vrot.slane %v321_v23, %v123_v22 }
  0xf7   :  { %v125_v26 = vmul.f32 %v124_v25, %v119_v24 }
  0xf9   :  { %v126_v27 = vadd.f32 %v125_v26, %v115_v21 }
  0xfb   :  { %322 = vtanh.f32 %v126_v27 }
 0x105   :  { %v323_v29 = vpop.eup %322 }
 0x106   :  { %v135_v31 = vrot.slane %v323_v29, %v134_v28 }
 0x108   :  { %v136_v32 = vmul.f32 %v135_v31, %v130_v30 }
 0x10a   :  { %v137_v33 = vadd.f32 %v136_v32, %v126_v27 }
 0x10c   :  { %324 = vtanh.f32 %v137_v33 }
 0x116   :  { %v325_v35 = vpop.eup %324 }
 0x117   :  { %v146_v37 = vrot.slane %v325_v35, %v145_v34 }
 0x119   :  { %v147_v38 = vmul.f32 %v146_v37, %v141_v36 }
 0x11b   :  { %v148_v39 = vadd.f32 %v147_v38, %v137_v33 }
 0x11d   :  { %326 = vtanh.f32 %v148_v39 }
 0x127   :  { %v327_v41 = vpop.eup %326 }
 0x128   :  { %v157_v43 = vrot.slane %v327_v41, %v156_v40 }
 0x12a   :  { %v158_v44 = vmul.f32 %v157_v43, %v152_v42 }
 0x12c   :  { %v159_v45 = vadd.f32 %v158_v44, %v148_v39 }
 0x12e   :  { %328 = vtanh.f32 %v159_v45 }
 0x138   :  { %v329_v47 = vpop.eup %328 }
 0x139   :  { %v168_v49 = vrot.slane %v329_v47, %v167_v46 }
 0x13b   :  { %v169_v50 = vmul.f32 %v168_v49, %v163_v48 }
 0x13d   :  { %v170_v51 = vadd.f32 %v169_v50, %v159_v45 }
 0x13f   :  { %330 = vtanh.f32 %v170_v51 }
 0x149   :  { %v331_v53 = vpop.eup %330 }
 0x14a   :  { %v179_v55 = vrot.slane %v331_v53, %v178_v52 }
 0x14c   :  { %v180_v56 = vmul.f32 %v179_v55, %v174_v54 }
 0x14e   :  { %v181_v57 = vadd.f32 %v180_v56, %v170_v51 }
 0x150   :  { %332 = vtanh.f32 %v181_v57 }
 0x15a   :  { %v333_v59 = vpop.eup %332 }
 0x15b   :  { %296 = vmatpush3.msra.mxu1 %v333_v59 }
 0x15c   :  { %298 = vmatmul.mubr.msk.f32.vlgmr.msra.gmra.mrb[0].mxu1 %vm21_vm0, %v183_v58 }
 0x22f   :  { %v253_v60 = vpop.f32.mrb[0].mxu1 }
 0x230   :  { %v257_v61 = vadd.f32 %v294_v12, %v253_v60  ;;  %v299_v62 = vpop.f32.mrb[1].mxu1 }
 0x232   :  { %v284_v63 = vmul.f32 -1.442695, %v257_v61 }
 0x234   :  { %334 = vpow2.f32 %v284_v63 }
 0x23e   :  { %v335_v0 = vpop.eup %334 }
 0x23f   :  { %v261_v1 = vadd.f32 1.0, %v335_v0 }
 0x241   :  { %336 = vrcp.f32 %v261_v1 }
 0x24b   :  { %v337_v2 = vpop.eup %336 }
 0x24c   :  { %v264_v3 = vmul.f32 4.8, %v337_v2 }
 0x24e   :  { %v265_v4 = vadd.f32 8.0, %v264_v3 }
 0x250   :  { %266 = vst [vmem:[#allocation2] sm:$0xff] %v265_v4 }
 0x251   :  { %349 = shalt.err (!%p346_p4)
}
 0x252   :  { %s350_s26 = scalar_lea.hbm %s431_s4, 128 }
 0x253   :  { %p351_p5 = scmp.ne.s32.totalorder %s431_s4, %s350_s26  ;;  %p354_p6 = scmp.lt.u32.totalorder %s350_s26, %s431_s4 }
 0x255   :  { %p356_p7 = pnand %p354_p6, %p351_p5 }
 0x257   :  { %359 = shalt.err (!%p356_p7)
}
 0x258   :  { %276 = dma.vmem_to_hbm [thread:$0]  %s274_s23, 128, %s431_s4, [#allocation3]  }
 0x259   :  { %360 = dma.done.wait [#allocation3], 128  }
 0x25a   :  { %361 = vsyncadd [#allocation3], 4294967168 }
 0x25b   :  { %280 = vsyncpa [#allocation3], 1 }

</bundles_post_ra>
